<compile_context>
chip_gen: v5e
topology: v5e:2x2
jax: 0.10.0
libtpu: 0.0.40
codegen_flags: <defaults>
</compile_context>

<pallas_src>
import functools

import jax
import jax.numpy as jnp
from jax.experimental import pallas as pl
from jax.experimental.pallas import tpu as pltpu


def _cdiv(a, b):
    return -(-a // b)


def _round_up(a, b):
    return _cdiv(a, b) * b


def _vmem_capacity_bytes(default=64 * 2**20):
    """Trace-time VMEM capacity query with a conservative fallback."""
    try:
        info = pltpu.get_tpu_info()
        cap = getattr(info, "vmem_capacity_bytes", None)
        if cap:
            return int(cap)
    except Exception:
        pass
    return default


def _ufl_kernel(x_ref, t_ref, tp_ref, f_ref, xs_ref, ts_ref, *,
                gamma, delta, binary, block_cols, total_cols, col_tail):
    """One (TR, L) block: elementwise focal loss + per-row partial sums.

    Outputs ((TR, 1) blocks, accumulated across the column grid axis — the
    last / "arbitrary" axis — so they stay VMEM resident between steps):
      tp_ref : per-row sum of x * t
      f_ref  : per-row sum of focal-loss elements
      xs_ref : per-row sum of x
      ts_ref : per-row sum of t
    """
    j = pl.program_id(1)

    @pl.when(j == 0)
    def _init():
        tp_ref[...] = jnp.zeros_like(tp_ref)
        f_ref[...] = jnp.zeros_like(f_ref)
        xs_ref[...] = jnp.zeros_like(xs_ref)
        ts_ref[...] = jnp.zeros_like(ts_ref)

    x = x_ref[...].astype(jnp.float32)
    t = t_ref[...].astype(jnp.float32)

    if col_tail:  # static: only emitted when S % L != 0
        col = jax.lax.broadcasted_iota(jnp.int32, x.shape, 1) + j * block_cols
        valid = col < total_cols
        x = jnp.where(valid, x, 0.0)
        t = jnp.where(valid, t, 0.0)

    xt = x * t  # shared by z (binary path), bce (general path) and the tp sum
    if binary:
        # Exact for t in {0, 1}:
        #   bce        = softplus(-z),   z = (2t - 1) x
        #   (1 - pt)^g = exp(-g * softplus(z))
        z = 2.0 * xt - x
        lse = jnp.log1p(jnp.exp(-jnp.abs(z)))       # log(1 + e^{-|z|})
        bce = jnp.maximum(-z, 0.0) + lse            # softplus(-z)
        spz = jnp.maximum(z, 0.0) + lse             # softplus(z)
        f = jnp.exp(-gamma * spz) * bce
    else:
        # General soft-label form, element-for-element like the PyTorch module.
        bce = jnp.maximum(x, 0.0) - xt + jnp.log1p(jnp.exp(-jnp.abs(x)))
        p = jax.nn.sigmoid(x)
        pt = p * t + (1.0 - p) * (1.0 - t)
        f = (1.0 - pt) ** gamma * bce
    if delta >= 0:  # static Python branch, mirrors FocalLoss alpha handling
        # delta*t + (1-delta)*(1-t)  ==  (2*delta-1)*t + (1-delta)   (one fma)
        f = ((2.0 * delta - 1.0) * t + (1.0 - delta)) * f
    if col_tail:
        # masked (x=0, t=0) elements produce a non-zero focal value -> zero it
        f = jnp.where(valid, f, 0.0)

    tp_ref[...] += jnp.sum(xt, axis=1, keepdims=True)
    f_ref[...] += jnp.sum(f, axis=1, keepdims=True)
    xs_ref[...] += jnp.sum(x, axis=1, keepdims=True)
    ts_ref[...] += jnp.sum(t, axis=1, keepdims=True)


def unified_focal_loss(inputs, target, *, delta, gamma, lmbda,
                       reduction="mean", assume_binary_targets=True):
    """JAX/Pallas equivalent of UnifiedFocalLoss(delta, gamma, lmbda).forward.

    `assume_binary_targets=True` uses an exact fast path for t in {0, 1};
    pass False for soft/smoothed labels (matches PyTorch element-by-element).
    Inputs may be bf16 (kernel upcasts to f32) to halve HBM traffic.
    """
    assert inputs.shape == target.shape and inputs.ndim == 4
    N, C, H, W = inputs.shape
    R, S = N * C, H * W

    # NCHW -> (N*C, H*W): contiguous reshape, no transpose, no extra HBM pass.
    x2 = inputs.reshape(R, S)
    t2 = target.reshape(R, S)

    elem_bytes = x2.dtype.itemsize + t2.dtype.itemsize
    vmem_cap = _vmem_capacity_bytes()
    # Combined (x + t) bytes per grid step; double buffering keeps input
    # residency at ~2x this, i.e. <= ~vmem_cap / 2.
    pair_budget = max(4 * 2**20, min(32 * 2**20, vmem_cap // 4))

    S128 = _round_up(S, 128)
    R8 = _round_up(R, 8)
    MAX_TR = 1024  # bounds the lane-padded (TR, 1) output buffers

    # Pick L (lane width) first and keep it as large as possible, then TR.
    if 8 * S128 * elem_bytes <= pair_budget:
        L = S128                                    # full rows: contiguous DMAs
        TR = min(R8, MAX_TR,
                 max(8, (pair_budget // (L * elem_bytes)) // 8 * 8))
    else:
        TR = 8                                      # huge rows: split lane axis
        L = min(S128, max(128, (pair_budget // (8 * elem_bytes)) // 128 * 128))

    n_row = _cdiv(R, TR)
    n_col = _cdiv(S, L)
    col_tail = (S % L) != 0

    kernel = functools.partial(
        _ufl_kernel, gamma=float(gamma), delta=float(delta),
        binary=bool(assume_binary_targets), block_cols=L, total_cols=S,
        col_tail=col_tail)

    in_spec = pl.BlockSpec((TR, L), lambda i, j: (i, j))
    out_spec = pl.BlockSpec((TR, 1), lambda i, j: (i, 0))
    out_sds = jax.ShapeDtypeStruct((n_row * TR, 1), jnp.float32)

    blk_in = TR * L * elem_bytes
    blk_out = 4 * TR * 128 * 4            # four (TR,1) f32 blocks, lane-padded
    resident = 2 * blk_in + 2 * blk_out   # double-buffered
    vmem_limit = int(max(32 * 2**20,
                         min(vmem_cap - 4 * 2**20, resident + 8 * 2**20)))

    tp_pr, f_pr, x_pr, t_pr = pl.pallas_call(
        kernel,
        out_shape=(out_sds, out_sds, out_sds, out_sds),
        grid=(n_row, n_col),
        in_specs=[in_spec, in_spec],
        out_specs=(out_spec, out_spec, out_spec, out_spec),
        compiler_params=pltpu.CompilerParams(
            # TODO(synk): on v7x, try CORE_PARALLEL on the row axis (or
            # pl.core_map over a tensorcore mesh) to pin both TensorCores.
            dimension_semantics=("parallel", "arbitrary"),
            vmem_limit_bytes=vmem_limit),
    )(x2, t2)

    # ---- glue: tiny O(N*C) combine (garbage tail rows are sliced off) ----
    tp_row = tp_pr[:R, 0]
    f_row = f_pr[:R, 0]
    x_row = x_pr[:R, 0]
    t_row = t_pr[:R, 0]

    focal = f_row.sum() / jnp.float32(N * C * H * W)          # FocalLoss (mean)

    smooth = 1e-05
    tp_c = tp_row.reshape(N, C).sum(axis=0)                   # per-channel TP
    fp = x_row.sum() - tp_c
    fn = t_row.sum() - tp_c
    tversky = (2.0 * tp_c + smooth) / (
        2.0 * tp_c + delta * fp + (1.0 - delta) * fn + smooth)
    ftl = jnp.mean((1.0 - tversky) ** gamma)                  # FocalTverskyLoss

    loss = lmbda * focal + (1.0 - lmbda) * ftl                # scalar
    if reduction == "mean":
        return jnp.mean(loss)
    elif reduction == "sum":
        return jnp.sum(loss)
    else:
        return loss


def _reference(inputs, target, *, delta, gamma, lmbda):
    """Pure-JAX reference mirroring the PyTorch module (general form)."""
    x = inputs.astype(jnp.float32)
    t = target.astype(jnp.float32)
    bce = jnp.maximum(x, 0.0) - x * t + jnp.log1p(jnp.exp(-jnp.abs(x)))
    p = jax.nn.sigmoid(x)
    pt = p * t + (1 - p) * (1 - t)
    f = (1 - pt) ** gamma * bce
    if delta >= 0:
        f = (delta * t + (1 - delta) * (1 - t)) * f
    focal = jnp.mean(f)

    smooth = 1e-05
    tp = jnp.sum(x * t, axis=(0, 2, 3))
    fp = jnp.sum(x) - tp
    fn = jnp.sum(t) - tp
    tversky = (2 * tp + smooth) / (2 * tp + delta * fp + (1 - delta) * fn + smooth)
    ftl = jnp.mean((1 - tversky) ** gamma)
    return lmbda * focal + (1 - lmbda) * ftl


if __name__ == "__main__":
    # deterministic parameters (UnifiedFocalLoss.__init__ args)
    delta, gamma, lmbda = 0.6, 0.75, 0.5

    key = jax.random.PRNGKey(0)
    k1, k2, k3, k4 = jax.random.split(key, 4)

    # Primary small NCHW example (tiles divide exactly -> no tail masking).
    N, C, H, W = 2, 4, 16, 16
    inputs = jax.random.normal(k1, (N, C, H, W), dtype=jnp.float32)      # logits
    target = (jax.random.uniform(k2, (N, C, H, W)) > 0.5).astype(jnp.float32)

    out = unified_focal_loss(inputs, target, delta=delta, gamma=gamma,
                             lmbda=lmbda, assume_binary_targets=True)
    out = jax.block_until_ready(out)
    ref = _reference(inputs, target, delta=delta, gamma=gamma, lmbda=lmbda)
    assert jnp.allclose(out, ref, rtol=1e-5, atol=1e-5), (out, ref)

    # Odd shape: exercises in-kernel column-tail masking (no jnp.pad pre-pass).
    N2, C2, H2, W2 = 2, 3, 15, 13
    inputs2 = jax.random.normal(k3, (N2, C2, H2, W2), dtype=jnp.float32)
    target2 = (jax.random.uniform(k4, (N2, C2, H2, W2)) > 0.5).astype(jnp.float32)
    out2 = unified_focal_loss(inputs2, target2, delta=delta, gamma=gamma,
                              lmbda=lmbda, assume_binary_targets=True)
    out2 = jax.block_until_ready(out2)
    ref2 = _reference(inputs2, target2, delta=delta, gamma=gamma, lmbda=lmbda)
    assert jnp.allclose(out2, ref2, rtol=1e-5, atol=1e-5), (out2, ref2)

    print("KERNEL_OK")
</pallas_src>

<mosaic_0001>
module attributes {stable_mosaic.version = 11 : i64} {
  func.func @_ufl_kernel(%arg0: i32, %arg1: i32, %arg2: memref<8x256xf32, #tpu.memory_space<vmem>>, %arg3: memref<8x256xf32, #tpu.memory_space<vmem>>, %arg4: memref<8x1xf32, #tpu.memory_space<vmem>>, %arg5: memref<8x1xf32, #tpu.memory_space<vmem>>, %arg6: memref<8x1xf32, #tpu.memory_space<vmem>>, %arg7: memref<8x1xf32, #tpu.memory_space<vmem>>) attributes {dimension_semantics = [#tpu.dimension_semantics<parallel>, #tpu.dimension_semantics<arbitrary>], iteration_bounds = array<i64: 1, 1>, scalar_prefetch = 0 : i64, scratch_operands = 0 : i64, tpu.core_type = #tpu.core_type<tc>, window_params = [{transform_indices = @transform_0, window_bounds = array<i64: 8, 256>}, {transform_indices = @transform_1, window_bounds = array<i64: 8, 256>}, {transform_indices = @transform_2, window_bounds = array<i64: 8, 1>}, {transform_indices = @transform_3, window_bounds = array<i64: 8, 1>}, {transform_indices = @transform_4, window_bounds = array<i64: 8, 1>}, {transform_indices = @transform_5, window_bounds = array<i64: 8, 1>}]} {
    %c0_i32 = arith.constant 0 : i32
    %0 = arith.cmpi eq, %arg1, %c0_i32 : i32
    %1 = arith.extui %0 : i1 to i32
    %c0_i32_0 = arith.constant 0 : i32
    %2 = arith.cmpi ne, %1, %c0_i32_0 : i32
    scf.if %2 {
      %cst_31 = arith.constant 0.000000e+00 : f32
      %51 = vector.broadcast %cst_31 : f32 to vector<8x1xf32>
      %c0_32 = arith.constant 0 : index
      %c0_33 = arith.constant 0 : index
      %52 = vector.load %arg4[%c0_32, %c0_33] : memref<8x1xf32, #tpu.memory_space<vmem>>, vector<8x1xf32>
      tpu.vector_store %arg4[%c0_32, %c0_33], %51 {strides = array<i32>} : memref<8x1xf32, #tpu.memory_space<vmem>>, vector<8x1xf32>,
      %cst_34 = arith.constant 0.000000e+00 : f32
      %53 = vector.broadcast %cst_34 : f32 to vector<8x1xf32>
      %c0_35 = arith.constant 0 : index
      %c0_36 = arith.constant 0 : index
      %54 = vector.load %arg5[%c0_35, %c0_36] : memref<8x1xf32, #tpu.memory_space<vmem>>, vector<8x1xf32>
      tpu.vector_store %arg5[%c0_35, %c0_36], %53 {strides = array<i32>} : memref<8x1xf32, #tpu.memory_space<vmem>>, vector<8x1xf32>,
      %cst_37 = arith.constant 0.000000e+00 : f32
      %55 = vector.broadcast %cst_37 : f32 to vector<8x1xf32>
      %c0_38 = arith.constant 0 : index
      %c0_39 = arith.constant 0 : index
      %56 = vector.load %arg6[%c0_38, %c0_39] : memref<8x1xf32, #tpu.memory_space<vmem>>, vector<8x1xf32>
      tpu.vector_store %arg6[%c0_38, %c0_39], %55 {strides = array<i32>} : memref<8x1xf32, #tpu.memory_space<vmem>>, vector<8x1xf32>,
      %cst_40 = arith.constant 0.000000e+00 : f32
      %57 = vector.broadcast %cst_40 : f32 to vector<8x1xf32>
      %c0_41 = arith.constant 0 : index
      %c0_42 = arith.constant 0 : index
      %58 = vector.load %arg7[%c0_41, %c0_42] : memref<8x1xf32, #tpu.memory_space<vmem>>, vector<8x1xf32>
      tpu.vector_store %arg7[%c0_41, %c0_42], %57 {strides = array<i32>} : memref<8x1xf32, #tpu.memory_space<vmem>>, vector<8x1xf32>,
    } else {
    }
    %c0 = arith.constant 0 : index
    %c0_1 = arith.constant 0 : index
    %3 = vector.load %arg2[%c0, %c0_1] : memref<8x256xf32, #tpu.memory_space<vmem>>, vector<8x256xf32>
    %c0_2 = arith.constant 0 : index
    %c0_3 = arith.constant 0 : index
    %4 = vector.load %arg3[%c0_2, %c0_3] : memref<8x256xf32, #tpu.memory_space<vmem>>, vector<8x256xf32>
    %5 = arith.mulf %3, %4 : vector<8x256xf32>
    %cst = arith.constant 2.000000e+00 : f32
    %6 = vector.broadcast %cst : f32 to vector<8x256xf32>
    %7 = arith.mulf %6, %5 : vector<8x256xf32>
    %8 = arith.subf %7, %3 : vector<8x256xf32>
    %9 = math.absf %8 : vector<8x256xf32>
    %cst_4 = arith.constant 0.000000e+00 : f32
    %10 = vector.broadcast %cst_4 : f32 to vector<8x256xf32>
    %11 = arith.subf %10, %9 : vector<8x256xf32>
    %12 = math.exp %11 : vector<8x256xf32>
    %13 = math.log1p %12 : vector<8x256xf32>
    %cst_5 = arith.constant 0.000000e+00 : f32
    %14 = vector.broadcast %cst_5 : f32 to vector<8x256xf32>
    %15 = arith.subf %14, %8 : vector<8x256xf32>
    %cst_6 = arith.constant 0.000000e+00 : f32
    %16 = vector.broadcast %cst_6 : f32 to vector<8x256xf32>
    %17 = arith.maximumf %15, %16 : vector<8x256xf32>
    %18 = arith.addf %17, %13 : vector<8x256xf32>
    %cst_7 = arith.constant 0.000000e+00 : f32
    %19 = vector.broadcast %cst_7 : f32 to vector<8x256xf32>
    %20 = arith.maximumf %8, %19 : vector<8x256xf32>
    %21 = arith.addf %20, %13 : vector<8x256xf32>
    %cst_8 = arith.constant -7.500000e-01 : f32
    %22 = vector.broadcast %cst_8 : f32 to vector<8x256xf32>
    %23 = arith.mulf %22, %21 : vector<8x256xf32>
    %24 = math.exp %23 : vector<8x256xf32>
    %25 = arith.mulf %24, %18 : vector<8x256xf32>
    %cst_9 = arith.constant 2.000000e-01 : f32
    %26 = vector.broadcast %cst_9 : f32 to vector<8x256xf32>
    %27 = arith.mulf %26, %4 : vector<8x256xf32>
    %cst_10 = arith.constant 4.000000e-01 : f32
    %28 = vector.broadcast %cst_10 : f32 to vector<8x256xf32>
    %29 = arith.addf %27, %28 : vector<8x256xf32>
    %30 = arith.mulf %29, %25 : vector<8x256xf32>
    %c0_11 = arith.constant 0 : index
    %c0_12 = arith.constant 0 : index
    %31 = vector.load %arg4[%c0_11, %c0_12] : memref<8x1xf32, #tpu.memory_space<vmem>>, vector<8x1xf32>
    %cst_13 = arith.constant dense<0.000000e+00> : vector<8xf32>
    %32 = vector.multi_reduction <add>, %5, %cst_13 [1] : vector<8x256xf32> to vector<8xf32>
    %33 = vector.shape_cast %32 : vector<8xf32> to vector<8x1xf32>
    %34 = arith.addf %31, %33 : vector<8x1xf32>
    %c0_14 = arith.constant 0 : index
    %c0_15 = arith.constant 0 : index
    %35 = vector.load %arg4[%c0_14, %c0_15] : memref<8x1xf32, #tpu.memory_space<vmem>>, vector<8x1xf32>
    tpu.vector_store %arg4[%c0_14, %c0_15], %34 {strides = array<i32>} : memref<8x1xf32, #tpu.memory_space<vmem>>, vector<8x1xf32>,
    %c0_16 = arith.constant 0 : index
    %c0_17 = arith.constant 0 : index
    %36 = vector.load %arg5[%c0_16, %c0_17] : memref<8x1xf32, #tpu.memory_space<vmem>>, vector<8x1xf32>
    %cst_18 = arith.constant dense<0.000000e+00> : vector<8xf32>
    %37 = vector.multi_reduction <add>, %30, %cst_18 [1] : vector<8x256xf32> to vector<8xf32>
    %38 = vector.shape_cast %37 : vector<8xf32> to vector<8x1xf32>
    %39 = arith.addf %36, %38 : vector<8x1xf32>
    %c0_19 = arith.constant 0 : index
    %c0_20 = arith.constant 0 : index
    %40 = vector.load %arg5[%c0_19, %c0_20] : memref<8x1xf32, #tpu.memory_space<vmem>>, vector<8x1xf32>
    tpu.vector_store %arg5[%c0_19, %c0_20], %39 {strides = array<i32>} : memref<8x1xf32, #tpu.memory_space<vmem>>, vector<8x1xf32>,
    %c0_21 = arith.constant 0 : index
    %c0_22 = arith.constant 0 : index
    %41 = vector.load %arg6[%c0_21, %c0_22] : memref<8x1xf32, #tpu.memory_space<vmem>>, vector<8x1xf32>
    %cst_23 = arith.constant dense<0.000000e+00> : vector<8xf32>
    %42 = vector.multi_reduction <add>, %3, %cst_23 [1] : vector<8x256xf32> to vector<8xf32>
    %43 = vector.shape_cast %42 : vector<8xf32> to vector<8x1xf32>
    %44 = arith.addf %41, %43 : vector<8x1xf32>
    %c0_24 = arith.constant 0 : index
    %c0_25 = arith.constant 0 : index
    %45 = vector.load %arg6[%c0_24, %c0_25] : memref<8x1xf32, #tpu.memory_space<vmem>>, vector<8x1xf32>
    tpu.vector_store %arg6[%c0_24, %c0_25], %44 {strides = array<i32>} : memref<8x1xf32, #tpu.memory_space<vmem>>, vector<8x1xf32>,
    %c0_26 = arith.constant 0 : index
    %c0_27 = arith.constant 0 : index
    %46 = vector.load %arg7[%c0_26, %c0_27] : memref<8x1xf32, #tpu.memory_space<vmem>>, vector<8x1xf32>
    %cst_28 = arith.constant dense<0.000000e+00> : vector<8xf32>
    %47 = vector.multi_reduction <add>, %4, %cst_28 [1] : vector<8x256xf32> to vector<8xf32>
    %48 = vector.shape_cast %47 : vector<8xf32> to vector<8x1xf32>
    %49 = arith.addf %46, %48 : vector<8x1xf32>
    %c0_29 = arith.constant 0 : index
    %c0_30 = arith.constant 0 : index
    %50 = vector.load %arg7[%c0_29, %c0_30] : memref<8x1xf32, #tpu.memory_space<vmem>>, vector<8x1xf32>
    tpu.vector_store %arg7[%c0_29, %c0_30], %49 {strides = array<i32>} : memref<8x1xf32, #tpu.memory_space<vmem>>, vector<8x1xf32>,
    return
  }
  func.func @transform_0(%arg0: i32, %arg1: i32) -> (i32, i32) {
    %c0_i32 = arith.constant 0 : i32
    return %arg0, %arg1 : i32, i32
  }
  func.func @transform_1(%arg0: i32, %arg1: i32) -> (i32, i32) {
    %c0_i32 = arith.constant 0 : i32
    return %arg0, %arg1 : i32, i32
  }
  func.func @transform_2(%arg0: i32, %arg1: i32) -> (i32, i32) {
    %c0_i32 = arith.constant 0 : i32
    %c0_i32_0 = arith.constant 0 : i32
    return %arg0, %c0_i32 : i32, i32
  }
  func.func @transform_3(%arg0: i32, %arg1: i32) -> (i32, i32) {
    %c0_i32 = arith.constant 0 : i32
    %c0_i32_0 = arith.constant 0 : i32
    return %arg0, %c0_i32 : i32, i32
  }
  func.func @transform_4(%arg0: i32, %arg1: i32) -> (i32, i32) {
    %c0_i32 = arith.constant 0 : i32
    %c0_i32_0 = arith.constant 0 : i32
    return %arg0, %c0_i32 : i32, i32
  }
  func.func @transform_5(%arg0: i32, %arg1: i32) -> (i32, i32) {
    %c0_i32 = arith.constant 0 : i32
    %c0_i32_0 = arith.constant 0 : i32
    return %arg0, %c0_i32 : i32, i32
  }
}

</mosaic_0001>

<bundles_post_ra>
// kernel: tpu_custom_call.1
= control target key start
LH: loop header
LB: loop body
LE: loop exit
PB: predicated region body
PF: predicated region fallthrough
CT: control target
= control target key end

     0   :  { %11 = vsyncpa [#allocation3], 0  ;;  %s310_s0 = inlined_call_operand.hbm [shape: f32[8,256], index: 0, kind: input, shape index: {}]   ;;  %s311_s1 = inlined_call_operand.hbm [shape: f32[8,256], index: 1, kind: input, shape index: {}]   ;;  %s312_s2 = inlined_call_operand.vmem [shape: f32[8,1], index: 2, kind: output, shape index: {0}]   ;;  %s313_s3 = inlined_call_operand.vmem [shape: f32[8,1], index: 3, kind: output, shape index: {1}]   ;;  %s314_s4 = inlined_call_operand.vmem [shape: f32[8,1], index: 4, kind: output, shape index: {2}]   ;;  %s315_s5 = inlined_call_operand.vmem [shape: f32[8,1], index: 5, kind: output, shape index: {3}]  }
   0x1   :  { %s18_s20 = sshll.u32 %s310_s0, 4  ;;  %s19_s20 = int_to_ptr.hbm [resolvable:$true] %s18_s20 }
   0x2   :  { %12 = vsyncpa [#allocation5], 0  ;;  %s222_s21 = smov [#allocation2]   ;;  %s29_s25 = sshll.u32 %s311_s1, 4  ;;  %s30_s25 = int_to_ptr.hbm [resolvable:$true] %s29_s25 }
   0x3   :  { %s20_s22 = sshll.u32 %s222_s21, 4  ;;  %s223_s26 = smov [#allocation4]   ;;  %s21_s22 = int_to_ptr.vmem [resolvable:$true] %s20_s22 }
   0x4   :  { %23 = dma.hbm_to_vmem [thread:$0]  %s19_s20, 256, %s21_s22, [#allocation3]  }
   0x5   :  { %s31_s27 = sshll.u32 %s223_s26, 4  ;;  %s32_s27 = int_to_ptr.vmem [resolvable:$true] %s31_s27 }
   0x6   :  { %34 = dma.hbm_to_vmem [thread:$0]  %s30_s25, 256, %s32_s27, [#allocation5]  }
   0x7   :  { %218 = dma.done.wait [#allocation3], 256  }
   0x8   :  { %219 = vsyncadd [#allocation3], 4294967040 }
   0x9   :  { %220 = dma.done.wait [#allocation5], 256  }
   0xa   :  { %221 = vsyncadd [#allocation5], 4294967040  ;;  %v52_v0 = vld [vmem:[#allocation2] sm:$0xff]  ;;  %v53_v1 = vld [vmem:[#allocation2 + $0x8] sm:$0xff]  ;;  %vm47_vm0 = vcmask 7168   ;;  %v224_v25 = vmov 0.0  }
   0xb   :  { %v261_v2 = vld [vmem:[#allocation4] sm:$0xff]  ;;  %v126_v3 = vadd.f32 %v53_v1, %v52_v0  ;;  %v55_v4 = vld [vmem:[#allocation4 + $0x8] sm:$0xff]  ;;  %50 = vst.msk [vmem:[%s314_s4] sm:$0xff] %vm47_vm0, %v224_v25 }
   0xc   :  { %v56_v5 = vmul.f32 %v261_v2, %v52_v0  ;;  %v57_v6 = vmul.f32 %v55_v4, %v53_v1  ;;  %v132_v13 = vadd.f32 %v55_v4, %v261_v2  ;;  %48 = vst.msk [vmem:[%s312_s2] sm:$0xff] %vm47_vm0, %v224_v25  ;;  %v106_v50 = vmul.f32 0.2, %v261_v2 }
   0xd   :  { %127 = vadd.xlane.f32.xlu1 %v126_v3  ;;  %49 = vst.msk [vmem:[%s313_s3] sm:$0xff] %vm47_vm0, %v224_v25  ;;  %v107_v51 = vmul.f32 0.2, %v55_v4 }
   0xe   :  { %v58_v7 = vmul.f32 2.0, %v56_v5  ;;  %v59_v8 = vmul.f32 2.0, %v57_v6  ;;  %v113_v9 = vadd.f32 %v57_v6, %v56_v5  ;;  %51 = vst.msk [vmem:[%s315_s5] sm:$0xff] %vm47_vm0, %v224_v25  ;;  %v108_v54 = vadd.f32 0.4, %v106_v50 }
   0xf   :  { %v109_v56 = vadd.f32 0.4, %v107_v51 }
  0x10   :  { %v60_v10 = vsub.f32 %v58_v7, %v52_v0  ;;  %v61_v11 = vsub.f32 %v59_v8, %v53_v1  ;;  %114 = vadd.xlane.f32.xlu0 %v113_v9 }
  0x12   :  { %v62_v12 = vand.u32 2147483647, %v60_v10  ;;  %v63_v14 = vand.u32 2147483647, %v61_v11  ;;  %v94_v32 = vmax.f32 %v60_v10, 0.0  ;;  %v95_v35 = vmax.f32 %v61_v11, 0.0 }
  0x13   :  { %v88_v41 = vsub.f32 0.0, %v60_v10  ;;  %v89_v43 = vsub.f32 0.0, %v61_v11  ;;  %v125_v63 = vld [vmem:[%s314_s4] sm:$0xff] }
  0x14   :  { %v64_v15 = vsub.f32 0.0, %v62_v12  ;;  %v65_v16 = vsub.f32 0.0, %v63_v14  ;;  %v112_v2 = vld [vmem:[%s312_s2] sm:$0xff] }
  0x15   :  { %133 = vadd.xlane.f32.xlu1 %v132_v13  ;;  %v90_v47 = vmax.f32 %v88_v41, 0.0  ;;  %v91_v49 = vmax.f32 %v89_v43, 0.0  ;;  %v131_v5 = vld [vmem:[%s315_s5] sm:$0xff] }
  0x16   :  { %v66_v17 = vmul.f32 1.442695, %v64_v15  ;;  %v68_v18 = vmul.f32 1.442695, %v65_v16  ;;  %v119_v8 = vld [vmem:[%s313_s3] sm:$0xff] }
  0x18   :  { %158 = vpow2.f32 %v66_v17 }
  0x19   :  { %160 = vpow2.f32 %v68_v18 }
  0x1e   :  { %v159_v19 = vpop.eup %158 }
  0x1f   :  { %v161_v20 = vpop.eup %160  ;;  %v70_v21 = vadd.f32 1.0, %v159_v19  ;;  %v73_v22 = vmul.f32 -0.5, %v159_v19  ;;  %v76_v27 = vand.u32 2147483647, %v159_v19 }
  0x20   :  { %v79_v23 = vadd.f32 1.0, %v161_v20  ;;  %v82_v24 = vmul.f32 -0.5, %v161_v20  ;;  %v85_v29 = vand.u32 2147483647, %v161_v20 }
  0x21   :  { %162 = vlog2.f32 %v70_v21  ;;  %v74_v26 = vadd.f32 1.0, %v73_v22  ;;  %vm77_vm1 = vcmp.lt.f32.partialorder %v76_v27, 0.0004427343 }
  0x22   :  { %164 = vlog2.f32 %v79_v23  ;;  %v83_v28 = vadd.f32 1.0, %v82_v24  ;;  %vm86_vm2 = vcmp.lt.f32.partialorder %v85_v29, 0.0004427343 }
  0x23   :  { %v75_v30 = vmul.f32 %v159_v19, %v74_v26 }
  0x24   :  { %v84_v33 = vmul.f32 %v161_v20, %v83_v28 }
  0x27   :  { %v163_v31 = vpop.eup %162 }
  0x28   :  { %v165_v34 = vpop.eup %164  ;;  %v72_v36 = vmul.f32 0.6931472, %v163_v31 }
  0x29   :  { %v81_v37 = vmul.f32 0.6931472, %v165_v34 }
  0x2a   :  { %v78_v38 = vsel %vm77_vm1, %v75_v30, %v72_v36 }
  0x2b   :  { %v87_v39 = vsel %vm86_vm2, %v84_v33, %v81_v37  ;;  %v96_v40 = vadd.f32 %v94_v32, %v78_v38  ;;  %v92_v52 = vadd.f32 %v90_v47, %v78_v38 }
  0x2c   :  { %v97_v42 = vadd.f32 %v95_v35, %v87_v39  ;;  %v93_v53 = vadd.f32 %v91_v49, %v87_v39 }
  0x2d   :  { %v98_v44 = vmul.f32 -0.75, %v96_v40 }
  0x2e   :  { %v99_v45 = vmul.f32 -0.75, %v97_v42 }
  0x2f   :  { %v100_v46 = vmul.f32 1.442695, %v98_v44 }
  0x30   :  { %v102_v48 = vmul.f32 1.442695, %v99_v45 }
  0x31   :  { %166 = vpow2.f32 %v100_v46 }
  0x32   :  { %168 = vpow2.f32 %v102_v48 }
  0x37   :  { %v167_v55 = vpop.eup %166 }
  0x38   :  { %v169_v57 = vpop.eup %168  ;;  %v104_v58 = vmul.f32 %v167_v55, %v92_v52 }
  0x39   :  { %v105_v59 = vmul.f32 %v169_v57, %v93_v53 }
  0x3a   :  { %v110_v60 = vmul.f32 %v108_v54, %v104_v58 }
  0x3b   :  { %v111_v61 = vmul.f32 %v109_v56, %v105_v59 }
  0x3d   :  { %v120_v62 = vadd.f32 %v111_v61, %v110_v60 }
  0x3f   :  { %121 = vadd.xlane.f32.xlu0 %v120_v62 }
  0x80   :  { %v128_v0 = vpop.xlane.xlu1 %127 }
  0x81   :  { %v129_v1 = vadd.f32 %v128_v0, %v125_v63 }
  0x83   :  { %130 = vst.msk [vmem:[%s314_s4] sm:$0xff] %vm47_vm0, %v129_v1  ;;  %v115_v3 = vpop.xlane.xlu0 %114 }
  0x84   :  { %v116_v4 = vadd.f32 %v115_v3, %v112_v2 }
  0x86   :  { %118 = vst.msk [vmem:[%s312_s2] sm:$0xff] %vm47_vm0, %v116_v4 }
  0x88   :  { %v134_v6 = vpop.xlane.xlu1 %133 }
  0x89   :  { %v135_v7 = vadd.f32 %v134_v6, %v131_v5 }
  0x8b   :  { %136 = vst.msk [vmem:[%s315_s5] sm:$0xff] %vm47_vm0, %v135_v7 }
  0xb2   :  { %v122_v9 = vpop.xlane.xlu0 %121 }
  0xb3   :  { %v123_v10 = vadd.f32 %v122_v9, %v119_v8 }
  0xb5   :  { %124 = vst.msk [vmem:[%s313_s3] sm:$0xff] %vm47_vm0, %v123_v10 }
  0xb6   :  { %153 = vsyncpa [#allocation3], 1 }
  0xb7   :  { %154 = vsyncpa [#allocation5], 1 }

</bundles_post_ra>
